<compile_context>
chip_gen: v5e
topology: v5e:2x2
jax: 0.10.0
libtpu: 0.0.40
codegen_flags: <defaults>
</compile_context>

<pallas_src>
import functools

import jax
import jax.numpy as jnp
from jax.experimental import pallas as pl
from jax.experimental.pallas import tpu as pltpu


def _round_up(x, m):
    return ((x + m - 1) // m) * m


def _pick_time_unroll(T):
    for u in (4, 2, 1):
        if T % u == 0:
            return u
    return 1


# ----------------------------------------------------------------------------
# Pallas kernels
# ----------------------------------------------------------------------------
def lstm_recurrence_kernel(z_ref, whh_ref, hout_ref, h_sc, c_sc):
    """z_ref:   (TU, BB, 4*Hp)  precomputed x@Wih + bias for TU timesteps (bf16)
       whh_ref: (Hp, 4*Hp)      recurrent weights, gate-blocked (bf16)
       hout_ref:(BB, Hp)        final hidden state (written at last time block)
       h_sc/c_sc: (BB, Hp) f32 VMEM scratch, persistent across the time grid axis."""
    TU = z_ref.shape[0]
    Hp = h_sc.shape[1]
    t = pl.program_id(1)

    @pl.when(t == 0)
    def _init():
        h_sc[...] = jnp.zeros_like(h_sc)
        c_sc[...] = jnp.zeros_like(c_sc)

    whh = whh_ref[...]
    h = h_sc[...]
    c = c_sc[...]

    # Static unroll over the TU timesteps in this block: lets the scheduler interleave
    # the MXU (h@Whh), EUP (sigmoid/tanh) and VPU (gate math) work of adjacent steps.
    for k in range(TU):
        z = z_ref[k].astype(jnp.float32) + jnp.dot(
            h.astype(whh.dtype), whh, preferred_element_type=jnp.float32)
        # Gate order matches PyTorch nn.LSTM: [i, f, g, o]; slices are lane-aligned (Hp%128==0).
        i = jax.nn.sigmoid(z[:, 0 * Hp:1 * Hp])
        f = jax.nn.sigmoid(z[:, 1 * Hp:2 * Hp])
        g = jnp.tanh(z[:, 2 * Hp:3 * Hp])
        o = jax.nn.sigmoid(z[:, 3 * Hp:4 * Hp])
        c = f * c + i * g
        h = o * jnp.tanh(c)

    h_sc[...] = h
    c_sc[...] = c

    @pl.when(t == pl.num_programs(1) - 1)
    def _final():
        hout_ref[...] = h.astype(hout_ref.dtype)


def output_head_kernel(h_ref, wout_ref, bout_ref, out_ref):
    """h_ref: (Bp, Hp) bf16, wout_ref: (Hp, TILE_N) bf16, bout_ref: (1, TILE_N) f32,
       out_ref: (Bp, TILE_N) f32 (lane-dense tile)."""
    logits = jnp.dot(h_ref[...], wout_ref[...],
                     preferred_element_type=jnp.float32) + bout_ref[...]
    out_ref[...] = jax.nn.sigmoid(logits)


# ----------------------------------------------------------------------------
# Parameters
# ----------------------------------------------------------------------------
def init_params(key, num_items, num_categorys, num_pcategorys, hidden_size):
    H = hidden_size
    ks = jax.random.split(key, 9)
    s = 1.0 / jnp.sqrt(jnp.float32(H))
    u = lambda k, shp: jax.random.uniform(k, shp, jnp.float32, -s, s)
    return {
        # nn.Embedding default init is N(0,1)
        "emb_item": jax.random.normal(ks[0], (num_items, H), jnp.float32),
        "emb_cat": jax.random.normal(ks[1], (num_categorys, H), jnp.float32),
        "emb_pcat": jax.random.normal(ks[2], (num_pcategorys, H), jnp.float32),
        # nn.LSTM weights: (4H, 3H) / (4H, H), gate order [i, f, g, o]
        "w_ih": u(ks[3], (4 * H, 3 * H)),
        "w_hh": u(ks[4], (4 * H, H)),
        "b_ih": u(ks[5], (4 * H,)),
        "b_hh": u(ks[6], (4 * H,)),
        # nn.Linear(hidden_size, num_items)
        "w_out": u(ks[7], (num_items, H)),
        "b_out": u(ks[8], (num_items,)),
    }


def prepare_kernel_params(params, *, compute_dtype=jnp.bfloat16, n_tile=512):
    """One-time weight layout prep (transpose / pad / cast) so the per-call forward
    never re-materializes transposed weights through HBM."""
    H = params["w_hh"].shape[1]
    num_items = params["w_out"].shape[0]
    Hp = _round_up(H, 128)
    TILE_N = min(n_tile, _round_up(num_items, 128))
    Np = _round_up(num_items, TILE_N)

    # Recurrent weights: (4H, H) -> (H, 4H), gate-blocked, each gate padded to Hp lanes.
    whh_t = jnp.transpose(params["w_hh"].astype(jnp.float32)).reshape(H, 4, H)
    whh_t = jnp.pad(whh_t, ((0, Hp - H), (0, 0), (0, Hp - H)))
    whh_pad = whh_t.reshape(Hp, 4 * Hp).astype(compute_dtype)

    # Output head: (num_items, H) -> (Hp, Np) with lane-dense N tiles.
    wout_t = jnp.transpose(params["w_out"].astype(jnp.float32))
    wout_pad = jnp.pad(
        wout_t, ((0, Hp - H), (0, Np - num_items))).astype(compute_dtype)
    bout_pad = jnp.pad(params["b_out"].astype(jnp.float32),
                       (0, Np - num_items)).reshape(1, Np)

    return {
        "emb_item": params["emb_item"].astype(jnp.float32),
        "emb_cat": params["emb_cat"].astype(jnp.float32),
        "emb_pcat": params["emb_pcat"].astype(jnp.float32),
        "w_ih": params["w_ih"].astype(compute_dtype),                    # (4H, 3H)
        "bias": (params["b_ih"] + params["b_hh"]).astype(jnp.float32),   # (4H,)
        "whh_pad": whh_pad,      # (Hp, 4*Hp)
        "wout_pad": wout_pad,    # (Hp, Np)
        "bout_pad": bout_pad,    # (1, Np)
    }


# ----------------------------------------------------------------------------
# Forward
# ----------------------------------------------------------------------------
def session_lstm_forward(inp, kp, *, num_items):
    """inp: int32 (B, T, 3) with columns [item_id, category_id, parent_category_id]."""
    B, T, _ = inp.shape
    H = kp["w_ih"].shape[0] // 4
    Hp = kp["whh_pad"].shape[0]
    G = kp["whh_pad"].shape[1]          # 4 * Hp
    Np = kp["wout_pad"].shape[1]
    TILE_N = min(512, Np)
    cdt = kp["whh_pad"].dtype

    # Batch padding / blocking.  TODO(synk): for production, pack sessions so B >= 128
    # per block (toy B=2 is only padded to the 8-sublane minimum here).
    if B <= 128:
        Bp = _round_up(B, 8)
        BB = Bp
    else:
        Bp = _round_up(B, 128)
        BB = 128
    TU = _pick_time_unroll(T)

    # --- Embedding gathers, directly in time-major order (T, B, H each) -------------
    idx_tm = jnp.transpose(inp, (1, 0, 2))  # tiny int transpose; gather lands time-major
    x_tm = jnp.concatenate(
        [kp["emb_item"][idx_tm[:, :, 0]],
         kp["emb_cat"][idx_tm[:, :, 1]],
         kp["emb_pcat"][idx_tm[:, :, 2]]], axis=-1)          # (T, B, 3H) f32

    # --- Hoisted input projection: one big matmul for all timesteps (bf16 in, f32 acc)
    z_ih = jnp.einsum("tbk,gk->tbg", x_tm.astype(cdt), kp["w_ih"],
                      preferred_element_type=jnp.float32) + kp["bias"]   # (T, B, 4H)
    # Gate-blocked padding so each gate occupies its own Hp-wide lane-aligned block.
    z4 = z_ih.reshape(T, B, 4, H)
    z4 = jnp.pad(z4, ((0, 0), (0, Bp - B), (0, 0), (0, Hp - H)))
    z_pad = z4.reshape(T, Bp, G).astype(cdt)                 # (T, Bp, 4*Hp)

    # --- LSTM recurrence: grid (batch parallel, time arbitrary), h/c in VMEM scratch --
    h_last = pl.pallas_call(
        lstm_recurrence_kernel,
        out_shape=jax.ShapeDtypeStruct((Bp, Hp), cdt),
        grid_spec=pltpu.PrefetchScalarGridSpec(
            num_scalar_prefetch=0,
            grid=(Bp // BB, T // TU),
            in_specs=[
                pl.BlockSpec((TU, BB, G), lambda b, t: (t, b, 0)),   # pipelined Z slabs
                pl.BlockSpec((Hp, G), lambda b, t: (0, 0)),          # Whh resident
            ],
            out_specs=pl.BlockSpec((BB, Hp), lambda b, t: (b, 0)),
            scratch_shapes=[pltpu.VMEM((BB, Hp), jnp.float32),       # h
                            pltpu.VMEM((BB, Hp), jnp.float32)],      # c
        ),
        compiler_params=pltpu.CompilerParams(
            dimension_semantics=("parallel", "arbitrary"),
            vmem_limit_bytes=32 * 1024 * 1024,   # safe on v5e/v6e/v7x; actual use is far smaller
        ),
    )(z_pad, kp["whh_pad"])

    # --- Output head: tiled over num_items with lane-dense output tiles ---------------
    out_pad = pl.pallas_call(
        output_head_kernel,
        out_shape=jax.ShapeDtypeStruct((Bp, Np), jnp.float32),
        grid_spec=pltpu.PrefetchScalarGridSpec(
            num_scalar_prefetch=0,
            grid=(Np // TILE_N,),
            in_specs=[
                pl.BlockSpec((Bp, Hp), lambda n: (0, 0)),
                pl.BlockSpec((Hp, TILE_N), lambda n: (0, n)),
                pl.BlockSpec((1, TILE_N), lambda n: (0, n)),
            ],
            out_specs=pl.BlockSpec((Bp, TILE_N), lambda n: (0, n)),
        ),
        compiler_params=pltpu.CompilerParams(
            dimension_semantics=("parallel",),
            vmem_limit_bytes=32 * 1024 * 1024,
        ),
    )(h_last, kp["wout_pad"], kp["bout_pad"])

    return out_pad[:B, :num_items]


# ----------------------------------------------------------------------------
# Pure-JAX f32 reference (same math as the PyTorch module)
# ----------------------------------------------------------------------------
def reference_forward(inp, params):
    H = params["w_hh"].shape[1]
    e = jnp.concatenate(
        [params["emb_item"][inp[:, :, 0]],
         params["emb_cat"][inp[:, :, 1]],
         params["emb_pcat"][inp[:, :, 2]]], axis=-1)  # (B, T, 3H)
    B, T, _ = e.shape
    h = jnp.zeros((B, H), jnp.float32)
    c = jnp.zeros((B, H), jnp.float32)
    bias = params["b_ih"] + params["b_hh"]
    for t in range(T):
        z = e[:, t, :] @ params["w_ih"].T + h @ params["w_hh"].T + bias
        i = jax.nn.sigmoid(z[:, 0:H])
        f = jax.nn.sigmoid(z[:, H:2 * H])
        g = jnp.tanh(z[:, 2 * H:3 * H])
        o = jax.nn.sigmoid(z[:, 3 * H:4 * H])
        c = f * c + i * g
        h = o * jnp.tanh(c)
    return jax.nn.sigmoid(h @ params["w_out"].T + params["b_out"])


if __name__ == "__main__":
    B, T, H = 2, 8, 32
    num_items, num_categorys, num_pcategorys = 64, 16, 8

    key = jax.random.PRNGKey(0)
    pkey, ikey, ckey, pckey = jax.random.split(key, 4)
    params = init_params(pkey, num_items, num_categorys, num_pcategorys, H)
    kparams = prepare_kernel_params(params, compute_dtype=jnp.bfloat16)

    item_ids = jax.random.randint(ikey, (B, T, 1), 0, num_items, jnp.int32)
    cat_ids = jax.random.randint(ckey, (B, T, 1), 0, num_categorys, jnp.int32)
    pcat_ids = jax.random.randint(pckey, (B, T, 1), 0, num_pcategorys, jnp.int32)
    inp = jnp.concatenate([item_ids, cat_ids, pcat_ids], axis=-1)  # (B, T, 3)

    forward = jax.jit(functools.partial(session_lstm_forward, num_items=num_items))
    out = forward(inp, kparams)
    out = jax.block_until_ready(out)

    ref = reference_forward(inp, params)
    assert out.shape == (B, num_items)
    max_err = float(jnp.max(jnp.abs(out - ref)))
    # bf16 matmul operands -> relaxed tolerance vs the f32 reference (per review).
    assert max_err < 5e-2, f"mismatch vs reference, max abs err = {max_err}"

    print("KERNEL_OK")
</pallas_src>

<mosaic_0001>
module attributes {stable_mosaic.version = 11 : i64} {
  func.func @output_head_kernel(%arg0: i32, %arg1: memref<8x128xbf16, #tpu.memory_space<vmem>>, %arg2: memref<128x128xbf16, #tpu.memory_space<vmem>>, %arg3: memref<1x128xf32, #tpu.memory_space<vmem>>, %arg4: memref<8x128xf32, #tpu.memory_space<vmem>>) attributes {dimension_semantics = [#tpu.dimension_semantics<parallel>], iteration_bounds = array<i64: 1>, scalar_prefetch = 0 : i64, scratch_operands = 0 : i64, tpu.core_type = #tpu.core_type<tc>, window_params = [{pipeline_mode = #tpu.pipeline_mode<synchronous>, transform_indices = @transform_0, window_bounds = array<i64: 8, 128>}, {transform_indices = @transform_1, window_bounds = array<i64: 128, 128>}, {transform_indices = @transform_2, window_bounds = array<i64: 1, 128>}, {transform_indices = @transform_3, window_bounds = array<i64: 8, 128>}]} {
    %c0 = arith.constant 0 : index
    %c0_0 = arith.constant 0 : index
    %0 = vector.load %arg1[%c0, %c0_0] : memref<8x128xbf16, #tpu.memory_space<vmem>>, vector<8x128xbf16>
    %c0_1 = arith.constant 0 : index
    %c0_2 = arith.constant 0 : index
    %1 = vector.load %arg2[%c0_1, %c0_2] : memref<128x128xbf16, #tpu.memory_space<vmem>>, vector<128x128xbf16>
    %cst = arith.constant dense<0.000000e+00> : vector<8x128xf32>
    %2 = tpu.matmul %0, %1, %cst {dimension_numbers = #tpu.dot_dimension_numbers<[1], [0], [0], [1], [0, 0, 1, 1], [], []>} : vector<8x128xbf16>, vector<128x128xbf16>, vector<8x128xf32> -> vector<8x128xf32>
    %c0_3 = arith.constant 0 : index
    %c0_4 = arith.constant 0 : index
    %3 = vector.load %arg3[%c0_3, %c0_4] : memref<1x128xf32, #tpu.memory_space<vmem>>, vector<1x128xf32>
    %4 = vector.broadcast %3 : vector<1x128xf32> to vector<8x128xf32>
    %5 = arith.addf %2, %4 : vector<8x128xf32>
    %6 = arith.negf %5 : vector<8x128xf32>
    %7 = math.exp %6 : vector<8x128xf32>
    %cst_5 = arith.constant 1.000000e+00 : f32
    %8 = vector.broadcast %cst_5 : f32 to vector<8x128xf32>
    %9 = arith.addf %8, %7 : vector<8x128xf32>
    %10 = arith.divf %8, %9 : vector<8x128xf32>
    %c0_6 = arith.constant 0 : index
    %c0_7 = arith.constant 0 : index
    %11 = vector.load %arg4[%c0_6, %c0_7] : memref<8x128xf32, #tpu.memory_space<vmem>>, vector<8x128xf32>
    tpu.vector_store %arg4[%c0_6, %c0_7], %10 {strides = array<i32>} : memref<8x128xf32, #tpu.memory_space<vmem>>, vector<8x128xf32>,
    return
  }
  func.func @transform_0(%arg0: i32) -> (i32, i32) {
    %c0_i32 = arith.constant 0 : i32
    %c0_i32_0 = arith.constant 0 : i32
    %c0_i32_1 = arith.constant 0 : i32
    return %c0_i32, %c0_i32_0 : i32, i32
  }
  func.func @transform_1(%arg0: i32) -> (i32, i32) {
    %c0_i32 = arith.constant 0 : i32
    %c0_i32_0 = arith.constant 0 : i32
    return %c0_i32, %arg0 : i32, i32
  }
  func.func @transform_2(%arg0: i32) -> (i32, i32) {
    %c0_i32 = arith.constant 0 : i32
    %c0_i32_0 = arith.constant 0 : i32
    return %c0_i32, %arg0 : i32, i32
  }
  func.func @transform_3(%arg0: i32) -> (i32, i32) {
    %c0_i32 = arith.constant 0 : i32
    %c0_i32_0 = arith.constant 0 : i32
    return %c0_i32, %arg0 : i32, i32
  }
}

module attributes {stable_mosaic.version = 11 : i64} {
  func.func @lstm_recurrence_kernel(%arg0: i32, %arg1: i32, %arg2: memref<4x8x512xbf16, #tpu.memory_space<vmem>>, %arg3: memref<128x512xbf16, #tpu.memory_space<vmem>>, %arg4: memref<8x128xbf16, #tpu.memory_space<vmem>>, %arg5: memref<8x128xf32, #tpu.memory_space<vmem>>, %arg6: memref<8x128xf32, #tpu.memory_space<vmem>>) attributes {dimension_semantics = [#tpu.dimension_semantics<parallel>, #tpu.dimension_semantics<arbitrary>], iteration_bounds = array<i64: 1, 2>, scalar_prefetch = 0 : i64, scratch_operands = 2 : i64, tpu.core_type = #tpu.core_type<tc>, window_params = [{transform_indices = @transform_0, window_bounds = array<i64: 4, 8, 512>}, {pipeline_mode = #tpu.pipeline_mode<synchronous>, transform_indices = @transform_1, window_bounds = array<i64: 128, 512>}, {transform_indices = @transform_2, window_bounds = array<i64: 8, 128>}]} {
    %c0_i32 = arith.constant 0 : i32
    %0 = arith.cmpi eq, %arg1, %c0_i32 : i32
    %1 = arith.extui %0 : i1 to i32
    %c0_i32_0 = arith.constant 0 : i32
    %2 = arith.cmpi ne, %1, %c0_i32_0 : i32
    scf.if %2 {
      %cst_35 = arith.constant 0.000000e+00 : f32
      %135 = vector.broadcast %cst_35 : f32 to vector<8x128xf32>
      %c0_36 = arith.constant 0 : index
      %c0_37 = arith.constant 0 : index
      %136 = vector.load %arg5[%c0_36, %c0_37] : memref<8x128xf32, #tpu.memory_space<vmem>>, vector<8x128xf32>
      tpu.vector_store %arg5[%c0_36, %c0_37], %135 {strides = array<i32>} : memref<8x128xf32, #tpu.memory_space<vmem>>, vector<8x128xf32>,
      %cst_38 = arith.constant 0.000000e+00 : f32
      %137 = vector.broadcast %cst_38 : f32 to vector<8x128xf32>
      %c0_39 = arith.constant 0 : index
      %c0_40 = arith.constant 0 : index
      %138 = vector.load %arg6[%c0_39, %c0_40] : memref<8x128xf32, #tpu.memory_space<vmem>>, vector<8x128xf32>
      tpu.vector_store %arg6[%c0_39, %c0_40], %137 {strides = array<i32>} : memref<8x128xf32, #tpu.memory_space<vmem>>, vector<8x128xf32>,
    } else {
    }
    %c0 = arith.constant 0 : index
    %c0_1 = arith.constant 0 : index
    %3 = vector.load %arg3[%c0, %c0_1] : memref<128x512xbf16, #tpu.memory_space<vmem>>, vector<128x512xbf16>
    %c0_2 = arith.constant 0 : index
    %c0_3 = arith.constant 0 : index
    %4 = vector.load %arg5[%c0_2, %c0_3] : memref<8x128xf32, #tpu.memory_space<vmem>>, vector<8x128xf32>
    %c0_4 = arith.constant 0 : index
    %c0_5 = arith.constant 0 : index
    %5 = vector.load %arg6[%c0_4, %c0_5] : memref<8x128xf32, #tpu.memory_space<vmem>>, vector<8x128xf32>
    %c0_6 = arith.constant 0 : index
    %c0_7 = arith.constant 0 : index
    %c0_8 = arith.constant 0 : index
    %6 = vector.load %arg2[%c0_6, %c0_7, %c0_8] : memref<4x8x512xbf16, #tpu.memory_space<vmem>>, vector<1x8x512xbf16>
    %7 = vector.shape_cast %6 : vector<1x8x512xbf16> to vector<8x512xbf16>
    %8 = arith.extf %7 : vector<8x512xbf16> to vector<8x512xf32>
    %9 = arith.truncf %4 : vector<8x128xf32> to vector<8x128xbf16>
    %cst = arith.constant dense<0.000000e+00> : vector<8x512xf32>
    %10 = tpu.matmul %9, %3, %cst {dimension_numbers = #tpu.dot_dimension_numbers<[1], [0], [0], [1], [0, 0, 1, 1], [], []>} : vector<8x128xbf16>, vector<128x512xbf16>, vector<8x512xf32> -> vector<8x512xf32>
    %11 = arith.addf %8, %10 : vector<8x512xf32>
    %12 = vector.extract_strided_slice %11 {offsets = [0, 0], sizes = [8, 128], strides = [1, 1]} : vector<8x512xf32> to vector<8x128xf32>
    %13 = arith.negf %12 : vector<8x128xf32>
    %14 = math.exp %13 : vector<8x128xf32>
    %cst_9 = arith.constant 1.000000e+00 : f32
    %15 = vector.broadcast %cst_9 : f32 to vector<8x128xf32>
    %16 = arith.addf %15, %14 : vector<8x128xf32>
    %17 = arith.divf %15, %16 : vector<8x128xf32>
    %18 = vector.extract_strided_slice %11 {offsets = [0, 128], sizes = [8, 128], strides = [1, 1]} : vector<8x512xf32> to vector<8x128xf32>
    %19 = arith.negf %18 : vector<8x128xf32>
    %20 = math.exp %19 : vector<8x128xf32>
    %cst_10 = arith.constant 1.000000e+00 : f32
    %21 = vector.broadcast %cst_10 : f32 to vector<8x128xf32>
    %22 = arith.addf %21, %20 : vector<8x128xf32>
    %23 = arith.divf %21, %22 : vector<8x128xf32>
    %24 = vector.extract_strided_slice %11 {offsets = [0, 256], sizes = [8, 128], strides = [1, 1]} : vector<8x512xf32> to vector<8x128xf32>
    %25 = math.tanh %24 : vector<8x128xf32>
    %26 = vector.extract_strided_slice %11 {offsets = [0, 384], sizes = [8, 128], strides = [1, 1]} : vector<8x512xf32> to vector<8x128xf32>
    %27 = arith.negf %26 : vector<8x128xf32>
    %28 = math.exp %27 : vector<8x128xf32>
    %cst_11 = arith.constant 1.000000e+00 : f32
    %29 = vector.broadcast %cst_11 : f32 to vector<8x128xf32>
    %30 = arith.addf %29, %28 : vector<8x128xf32>
    %31 = arith.divf %29, %30 : vector<8x128xf32>
    %32 = arith.mulf %23, %5 : vector<8x128xf32>
    %33 = arith.mulf %17, %25 : vector<8x128xf32>
    %34 = arith.addf %32, %33 : vector<8x128xf32>
    %35 = math.tanh %34 : vector<8x128xf32>
    %36 = arith.mulf %31, %35 : vector<8x128xf32>
    %c1 = arith.constant 1 : index
    %c0_12 = arith.constant 0 : index
    %c0_13 = arith.constant 0 : index
    %37 = vector.load %arg2[%c1, %c0_12, %c0_13] : memref<4x8x512xbf16, #tpu.memory_space<vmem>>, vector<1x8x512xbf16>
    %38 = vector.shape_cast %37 : vector<1x8x512xbf16> to vector<8x512xbf16>
    %39 = arith.extf %38 : vector<8x512xbf16> to vector<8x512xf32>
    %40 = arith.truncf %36 : vector<8x128xf32> to vector<8x128xbf16>
    %cst_14 = arith.constant dense<0.000000e+00> : vector<8x512xf32>
    %41 = tpu.matmul %40, %3, %cst_14 {dimension_numbers = #tpu.dot_dimension_numbers<[1], [0], [0], [1], [0, 0, 1, 1], [], []>} : vector<8x128xbf16>, vector<128x512xbf16>, vector<8x512xf32> -> vector<8x512xf32>
    %42 = arith.addf %39, %41 : vector<8x512xf32>
    %43 = vector.extract_strided_slice %42 {offsets = [0, 0], sizes = [8, 128], strides = [1, 1]} : vector<8x512xf32> to vector<8x128xf32>
    %44 = arith.negf %43 : vector<8x128xf32>
    %45 = math.exp %44 : vector<8x128xf32>
    %cst_15 = arith.constant 1.000000e+00 : f32
    %46 = vector.broadcast %cst_15 : f32 to vector<8x128xf32>
    %47 = arith.addf %46, %45 : vector<8x128xf32>
    %48 = arith.divf %46, %47 : vector<8x128xf32>
    %49 = vector.extract_strided_slice %42 {offsets = [0, 128], sizes = [8, 128], strides = [1, 1]} : vector<8x512xf32> to vector<8x128xf32>
    %50 = arith.negf %49 : vector<8x128xf32>
    %51 = math.exp %50 : vector<8x128xf32>
    %cst_16 = arith.constant 1.000000e+00 : f32
    %52 = vector.broadcast %cst_16 : f32 to vector<8x128xf32>
    %53 = arith.addf %52, %51 : vector<8x128xf32>
    %54 = arith.divf %52, %53 : vector<8x128xf32>
    %55 = vector.extract_strided_slice %42 {offsets = [0, 256], sizes = [8, 128], strides = [1, 1]} : vector<8x512xf32> to vector<8x128xf32>
    %56 = math.tanh %55 : vector<8x128xf32>
    %57 = vector.extract_strided_slice %42 {offsets = [0, 384], sizes = [8, 128], strides = [1, 1]} : vector<8x512xf32> to vector<8x128xf32>
    %58 = arith.negf %57 : vector<8x128xf32>
    %59 = math.exp %58 : vector<8x128xf32>
    %cst_17 = arith.constant 1.000000e+00 : f32
    %60 = vector.broadcast %cst_17 : f32 to vector<8x128xf32>
    %61 = arith.addf %60, %59 : vector<8x128xf32>
    %62 = arith.divf %60, %61 : vector<8x128xf32>
    %63 = arith.mulf %54, %34 : vector<8x128xf32>
    %64 = arith.mulf %48, %56 : vector<8x128xf32>
    %65 = arith.addf %63, %64 : vector<8x128xf32>
    %66 = math.tanh %65 : vector<8x128xf32>
    %67 = arith.mulf %62, %66 : vector<8x128xf32>
    %c2 = arith.constant 2 : index
    %c0_18 = arith.constant 0 : index
    %c0_19 = arith.constant 0 : index
    %68 = vector.load %arg2[%c2, %c0_18, %c0_19] : memref<4x8x512xbf16, #tpu.memory_space<vmem>>, vector<1x8x512xbf16>
    %69 = vector.shape_cast %68 : vector<1x8x512xbf16> to vector<8x512xbf16>
    %70 = arith.extf %69 : vector<8x512xbf16> to vector<8x512xf32>
    %71 = arith.truncf %67 : vector<8x128xf32> to vector<8x128xbf16>
    %cst_20 = arith.constant dense<0.000000e+00> : vector<8x512xf32>
    %72 = tpu.matmul %71, %3, %cst_20 {dimension_numbers = #tpu.dot_dimension_numbers<[1], [0], [0], [1], [0, 0, 1, 1], [], []>} : vector<8x128xbf16>, vector<128x512xbf16>, vector<8x512xf32> -> vector<8x512xf32>
    %73 = arith.addf %70, %72 : vector<8x512xf32>
    %74 = vector.extract_strided_slice %73 {offsets = [0, 0], sizes = [8, 128], strides = [1, 1]} : vector<8x512xf32> to vector<8x128xf32>
    %75 = arith.negf %74 : vector<8x128xf32>
    %76 = math.exp %75 : vector<8x128xf32>
    %cst_21 = arith.constant 1.000000e+00 : f32
    %77 = vector.broadcast %cst_21 : f32 to vector<8x128xf32>
    %78 = arith.addf %77, %76 : vector<8x128xf32>
    %79 = arith.divf %77, %78 : vector<8x128xf32>
    %80 = vector.extract_strided_slice %73 {offsets = [0, 128], sizes = [8, 128], strides = [1, 1]} : vector<8x512xf32> to vector<8x128xf32>
    %81 = arith.negf %80 : vector<8x128xf32>
    %82 = math.exp %81 : vector<8x128xf32>
    %cst_22 = arith.constant 1.000000e+00 : f32
    %83 = vector.broadcast %cst_22 : f32 to vector<8x128xf32>
    %84 = arith.addf %83, %82 : vector<8x128xf32>
    %85 = arith.divf %83, %84 : vector<8x128xf32>
    %86 = vector.extract_strided_slice %73 {offsets = [0, 256], sizes = [8, 128], strides = [1, 1]} : vector<8x512xf32> to vector<8x128xf32>
    %87 = math.tanh %86 : vector<8x128xf32>
    %88 = vector.extract_strided_slice %73 {offsets = [0, 384], sizes = [8, 128], strides = [1, 1]} : vector<8x512xf32> to vector<8x128xf32>
    %89 = arith.negf %88 : vector<8x128xf32>
    %90 = math.exp %89 : vector<8x128xf32>
    %cst_23 = arith.constant 1.000000e+00 : f32
    %91 = vector.broadcast %cst_23 : f32 to vector<8x128xf32>
    %92 = arith.addf %91, %90 : vector<8x128xf32>
    %93 = arith.divf %91, %92 : vector<8x128xf32>
    %94 = arith.mulf %85, %65 : vector<8x128xf32>
    %95 = arith.mulf %79, %87 : vector<8x128xf32>
    %96 = arith.addf %94, %95 : vector<8x128xf32>
    %97 = math.tanh %96 : vector<8x128xf32>
    %98 = arith.mulf %93, %97 : vector<8x128xf32>
    %c3 = arith.constant 3 : index
    %c0_24 = arith.constant 0 : index
    %c0_25 = arith.constant 0 : index
    %99 = vector.load %arg2[%c3, %c0_24, %c0_25] : memref<4x8x512xbf16, #tpu.memory_space<vmem>>, vector<1x8x512xbf16>
    %100 = vector.shape_cast %99 : vector<1x8x512xbf16> to vector<8x512xbf16>
    %101 = arith.extf %100 : vector<8x512xbf16> to vector<8x512xf32>
    %102 = arith.truncf %98 : vector<8x128xf32> to vector<8x128xbf16>
    %cst_26 = arith.constant dense<0.000000e+00> : vector<8x512xf32>
    %103 = tpu.matmul %102, %3, %cst_26 {dimension_numbers = #tpu.dot_dimension_numbers<[1], [0], [0], [1], [0, 0, 1, 1], [], []>} : vector<8x128xbf16>, vector<128x512xbf16>, vector<8x512xf32> -> vector<8x512xf32>
    %104 = arith.addf %101, %103 : vector<8x512xf32>
    %105 = vector.extract_strided_slice %104 {offsets = [0, 0], sizes = [8, 128], strides = [1, 1]} : vector<8x512xf32> to vector<8x128xf32>
    %106 = arith.negf %105 : vector<8x128xf32>
    %107 = math.exp %106 : vector<8x128xf32>
    %cst_27 = arith.constant 1.000000e+00 : f32
    %108 = vector.broadcast %cst_27 : f32 to vector<8x128xf32>
    %109 = arith.addf %108, %107 : vector<8x128xf32>
    %110 = arith.divf %108, %109 : vector<8x128xf32>
    %111 = vector.extract_strided_slice %104 {offsets = [0, 128], sizes = [8, 128], strides = [1, 1]} : vector<8x512xf32> to vector<8x128xf32>
    %112 = arith.negf %111 : vector<8x128xf32>
    %113 = math.exp %112 : vector<8x128xf32>
    %cst_28 = arith.constant 1.000000e+00 : f32
    %114 = vector.broadcast %cst_28 : f32 to vector<8x128xf32>
    %115 = arith.addf %114, %113 : vector<8x128xf32>
    %116 = arith.divf %114, %115 : vector<8x128xf32>
    %117 = vector.extract_strided_slice %104 {offsets = [0, 256], sizes = [8, 128], strides = [1, 1]} : vector<8x512xf32> to vector<8x128xf32>
    %118 = math.tanh %117 : vector<8x128xf32>
    %119 = vector.extract_strided_slice %104 {offsets = [0, 384], sizes = [8, 128], strides = [1, 1]} : vector<8x512xf32> to vector<8x128xf32>
    %120 = arith.negf %119 : vector<8x128xf32>
    %121 = math.exp %120 : vector<8x128xf32>
    %cst_29 = arith.constant 1.000000e+00 : f32
    %122 = vector.broadcast %cst_29 : f32 to vector<8x128xf32>
    %123 = arith.addf %122, %121 : vector<8x128xf32>
    %124 = arith.divf %122, %123 : vector<8x128xf32>
    %125 = arith.mulf %116, %96 : vector<8x128xf32>
    %126 = arith.mulf %110, %118 : vector<8x128xf32>
    %127 = arith.addf %125, %126 : vector<8x128xf32>
    %128 = math.tanh %127 : vector<8x128xf32>
    %129 = arith.mulf %124, %128 : vector<8x128xf32>
    %c0_30 = arith.constant 0 : index
    %c0_31 = arith.constant 0 : index
    %130 = vector.load %arg5[%c0_30, %c0_31] : memref<8x128xf32, #tpu.memory_space<vmem>>, vector<8x128xf32>
    tpu.vector_store %arg5[%c0_30, %c0_31], %129 {strides = array<i32>} : memref<8x128xf32, #tpu.memory_space<vmem>>, vector<8x128xf32>,
    %c0_32 = arith.constant 0 : index
    %c0_33 = arith.constant 0 : index
    %131 = vector.load %arg6[%c0_32, %c0_33] : memref<8x128xf32, #tpu.memory_space<vmem>>, vector<8x128xf32>
    tpu.vector_store %arg6[%c0_32, %c0_33], %127 {strides = array<i32>} : memref<8x128xf32, #tpu.memory_space<vmem>>, vector<8x128xf32>,
    %c1_i32 = arith.constant 1 : i32
    %132 = arith.cmpi eq, %arg1, %c1_i32 : i32
    %133 = arith.extui %132 : i1 to i32
    %c0_i32_34 = arith.constant 0 : i32
    %134 = arith.cmpi ne, %133, %c0_i32_34 : i32
    scf.if %134 {
      %135 = arith.truncf %129 : vector<8x128xf32> to vector<8x128xbf16>
      %c0_35 = arith.constant 0 : index
      %c0_36 = arith.constant 0 : index
      %136 = vector.load %arg4[%c0_35, %c0_36] : memref<8x128xbf16, #tpu.memory_space<vmem>>, vector<8x128xbf16>
      tpu.vector_store %arg4[%c0_35, %c0_36], %135 {strides = array<i32>} : memref<8x128xbf16, #tpu.memory_space<vmem>>, vector<8x128xbf16>,
    } else {
    }
    return
  }
  func.func @transform_0(%arg0: i32, %arg1: i32) -> (i32, i32, i32) {
    %c0_i32 = arith.constant 0 : i32
    %c0_i32_0 = arith.constant 0 : i32
    return %arg1, %arg0, %c0_i32 : i32, i32, i32
  }
  func.func @transform_1(%arg0: i32, %arg1: i32) -> (i32, i32) {
    %c0_i32 = arith.constant 0 : i32
    %c0_i32_0 = arith.constant 0 : i32
    %c0_i32_1 = arith.constant 0 : i32
    return %c0_i32, %c0_i32_0 : i32, i32
  }
  func.func @transform_2(%arg0: i32, %arg1: i32) -> (i32, i32) {
    %c0_i32 = arith.constant 0 : i32
    %c0_i32_0 = arith.constant 0 : i32
    return %arg0, %c0_i32 : i32, i32
  }
}

</mosaic_0001>

<bundles_post_ra>
// kernel: session_lstm_forward.3
= control target key start
LH: loop header
LB: loop body
LE: loop exit
PB: predicated region body
PF: predicated region fallthrough
CT: control target
= control target key end

     0   :  { %s219_s1 = inlined_call_operand.vmem [shape: bf16[128,128], index: 1, kind: input, shape index: {}]   ;;  %s220_s2 = inlined_call_operand.vmem [shape: f32[1,128], index: 2, kind: input, shape index: {}]   ;;  %s221_s0 = inlined_call_operand.vmem [shape: bf16[8,128], index: 0, kind: input, shape index: {}]   ;;  %s222_s3 = inlined_call_operand.vmem [shape: f32[8,128], index: 3, kind: output, shape index: {}]  }
   0x1   :  { %v160_v0 = vld [vmem:[%s219_s1 + $0x38] sm:$0xff]  ;;  %v159_v1 = vld [vmem:[%s219_s1 + $0x30] sm:$0xff]  ;;  %v158_v2 = vld [vmem:[%s219_s1 + $0x28] sm:$0xff] }
   0x2   :  { %83 = vmatpush.bf16.msra.mxu0 %v160_v0  ;;  %v157_v3 = vld [vmem:[%s219_s1 + $0x20] sm:$0xff]  ;;  %v156_v4 = vld [vmem:[%s219_s1 + $0x18] sm:$0xff]  ;;  %v155_v5 = vld [vmem:[%s219_s1 + $0x10] sm:$0xff] }
   0x3   :  { %v154_v6 = vld [vmem:[%s219_s1 + $0x8] sm:$0xff]  ;;  %v153_v7 = vld [vmem:[%s219_s1] sm:$0xff] }
   0x4   :  { %v14_v8 = vld [vmem:[%s221_s0] sm:$0xf] }
   0x5   :  { %v161_v9 = vld [vmem:[%s220_s2] ss:$0 sm:$0xff] }
   0x6   :  { %84 = vmatpush.bf16.msra.mxu0 %v159_v1 }
   0xa   :  { %85 = vmatpush.bf16.msra.mxu0 %v158_v2 }
   0xe   :  { %86 = vmatpush.bf16.msra.mxu0 %v157_v3 }
  0x12   :  { %87 = vmatpush.bf16.msra.mxu0 %v156_v4 }
  0x16   :  { %88 = vmatpush.bf16.msra.mxu0 %v155_v5 }
  0x1a   :  { %89 = vmatpush.bf16.msra.mxu0 %v154_v6 }
  0x1e   :  { %90 = vmatpush.bf16.msra.mxu0 %v153_v7 }
  0x21   :  { %91 = vmatmul.bf16.vlgmr.msra.gmra.mxu0 %v14_v8 }
  0x9e   :  { %v92_v10 = vpop.f32.mrf.mxu0 }
  0x9f   :  { %v93_v11 = vadd.f32 %v161_v9, %v92_v10 }
  0xa1   :  { %v152_v12 = vmul.f32 -1.442695, %v93_v11 }
  0xa3   :  { %162 = vpow2.f32 %v152_v12 }
  0xa6   :  { %v94_v13 = vpop.f32.mrf.mxu0 }
  0xa9   :  { %v163_v14 = vpop.eup %162 }
  0xaa   :  { %v99_v15 = vadd.f32 1.0, %v163_v14 }
  0xac   :  { %164 = vrcp.f32 %v99_v15  ;;  %v111_v19 = vand.u32 2147483648, %v99_v15  ;;  %v109_v21 = vand.u32 2147483647, %v99_v15  ;;  %vm105_vm1 = vweird.f32 %v99_v15 }
  0xae   :  { %v112_v23 = vor.u32 1.1754944e-38, %v111_v19  ;;  %vm110_vm3 = vcmp.eq.f32.partialorder %v109_v21, 8.507059e+37 }
  0xb2   :  { %v165_v16 = vpop.eup %164 }
  0xb3   :  { %v101_v17 = vmul.f32 %v165_v16, %v99_v15  ;;  %vm106_vm0 = vweird.f32 %v165_v16 }
  0xb4   :  { %vm107_vm2 = vmor %vm105_vm1, %vm106_vm0 }
  0xb5   :  { %v102_v18 = vsub.f32 1.0, %v101_v17 }
  0xb7   :  { %v103_v20 = vmul.f32 %v165_v16, %v102_v18 }
  0xb9   :  { %v104_v22 = vadd.f32 %v165_v16, %v103_v20 }
  0xbb   :  { %v108_v24 = vsel %vm107_vm2, %v165_v16, %v104_v22 }
  0xbc   :  { %v113_v25 = vsel %vm110_vm3, %v112_v23, %v108_v24 }
  0xbd   :  { %115 = vst [vmem:[%s222_s3] sm:$0xff] %v113_v25 }

// kernel: session_lstm_forward.2
= control target key start
LH: loop header
LB: loop body
LE: loop exit
PB: predicated region body
PF: predicated region fallthrough
CT: control target
= control target key end

     0   :  { %s1276_s9 = smov 0   ;;  %s1278_s10 = smov 0   ;;  %s1720_s0 = inlined_call_operand.vmem [shape: bf16[8,8,512], index: 0, kind: input, shape index: {}]   ;;  %s1721_s1 = inlined_call_operand.vmem [shape: bf16[128,512], index: 1, kind: input, shape index: {}]   ;;  %s1722_s2 = inlined_call_operand.vmem [shape: bf16[8,128], index: 2, kind: output, shape index: {}]  }
   0x1   :  { %s1280_s11 = smov 0  }
   0x2 LB: > { %s21_s12 = sadd.s32 1, %s1254_s10  ;;  %p959_p0 = scmp.ge.s32.totalorder %s1258_s11, 1  ;;  %s1258_s11 = sphi %s1280_s11, %s12_s11   ;;  %s1254_s10 = sphi %s1278_s10, %s1724_s10   ;;  %s1250_s9 = sphi %s1276_s9, %s1723_s9  }
   0x3   : > { %p22_p1 = scmp.ge.s32.totalorder %s21_s12, 2  ;;  %p132_p2 = scmp.lt.s32.totalorder %s1258_s11, 3 }
   0x5   : > { %s1726_s12 = smov (%p22_p1, %s21_s12), 0  ;;  %p133_p3 = pnand %p959_p0, %p132_p2 }
   0x6   : > { %s960_s13 = sshll.u32 (!%p133_p3), %s1250_s9, 2  ;;  %p963_p5 = scmp.ne.s32.totalorder (!%p133_p3), %s1250_s9, 0 }
   0x7   : > { %136 = sbr.rel (%p133_p3) target bundleno = 745 (0x2e9), region = 28  ;;  %p159_p4 = scmp.lt.s32.totalorder (!%p133_p3), %s960_s13, 7 }
   0xc   : > { %s1728_s13 = smov (!%p159_p4, %s960_s13), 7  ;;  %176 = sbr.rel (%p963_p5) target bundleno = 20 (0x14), region = 32 }
   0xd   : > { %s1114_s14 = sshll.u32 %s1728_s13, 4 }
   0xe   : > { %s1300_s17 = scalar_lea.vmem %s1720_s0, %s1114_s14 }
  0x11   : > { %v1260_v0 = vmov 0.0  }
  0x12   : > { %177 = vst [vmem:[#allocation2] sm:$0xff] %v1260_v0 }
  0x13   : > { %178 = vst [vmem:[#allocation3] sm:$0xff] %v1260_v0 }
  0x14 PF: > { %v1078_v1 = vld [vmem:[%s1721_s1 + $0xe0] sm:$0xf]  ;;  %v1145_v2 = vld [vmem:[%s1721_s1 + $0xec] sm:$0xf0]  ;;  %v1143_v3 = vld [vmem:[%s1721_s1 + $0xe4] sm:$0xf] }
  0x15   : > { %v1312_v4 = vor.u32 %v1145_v2, %v1078_v1  ;;  %v1080_v5 = vld [vmem:[%s1721_s1 + $0xf0] sm:$0xf0]  ;;  %v1144_v6 = vld [vmem:[%s1721_s1 + $0xec] sm:$0xf]  ;;  %v1088_v7 = vld [vmem:[%s1721_s1 + $0xf8] sm:$0xf0] }
  0x16   : > { %v1323_v8 = vor.u32 %v1143_v3, %v1080_v5  ;;  %v1325_v9 = vor.u32 %v1144_v6, %v1088_v7  ;;  %v1062_v10 = vld [vmem:[%s1721_s1 + $0xc0] sm:$0xf]  ;;  %v1141_v11 = vld [vmem:[%s1721_s1 + $0xcc] sm:$0xf0]  ;;  %v1139_v12 = vld [vmem:[%s1721_s1 + $0xc4] sm:$0xf] }
  0x17   : > { %380 = vmatpush.bf16.msra.mxu0 %v1312_v4  ;;  %v1337_v13 = vor.u32 %v1141_v11, %v1062_v10  ;;  %v1064_v14 = vld [vmem:[%s1721_s1 + $0xd0] sm:$0xf0]  ;;  %v1140_v15 = vld [vmem:[%s1721_s1 + $0xcc] sm:$0xf]  ;;  %v1072_v16 = vld [vmem:[%s1721_s1 + $0xd8] sm:$0xf0] }
  0x18   : > { %393 = vmatpush.bf16.msra.mxu1 %v1323_v8  ;;  %419 = vmatpush.bf16.msra.mxu3 %v1325_v9  ;;  %v1350_v17 = vor.u32 %v1139_v12, %v1064_v14  ;;  %v1352_v18 = vor.u32 %v1140_v15, %v1072_v16  ;;  %v1086_v19 = vld [vmem:[%s1721_s1 + $0xe8] sm:$0xf]  ;;  %v1146_v20 = vld [vmem:[%s1721_s1 + $0xf4] sm:$0xf0]  ;;  %v1046_v21 = vld [vmem:[%s1721_s1 + $0xa0] sm:$0xf] }
  0x19   : > { %v1363_v22 = vor.u32 %v1146_v20, %v1086_v19  ;;  %v1137_v23 = vld [vmem:[%s1721_s1 + $0xac] sm:$0xf0]  ;;  %v1135_v24 = vld [vmem:[%s1721_s1 + $0xa4] sm:$0xf]  ;;  %v1048_v25 = vld [vmem:[%s1721_s1 + $0xb0] sm:$0xf0] }
  0x1a   : > { %v1136_v26 = vld [vmem:[%s1721_s1 + $0xac] sm:$0xf]  ;;  %v1056_v27 = vld [vmem:[%s1721_s1 + $0xb8] sm:$0xf0]  ;;  %v1070_v28 = vld [vmem:[%s1721_s1 + $0xc8] sm:$0xf]  ;;  %v1385_v29 = vor.u32 %v1137_v23, %v1046_v21  ;;  %v1398_v33 = vor.u32 %v1135_v24, %v1048_v25 }
  0x1b   : > { %381 = vmatpush.bf16.msra.mxu0 %v1337_v13  ;;  %406 = vmatpush.bf16.msra.mxu2 %v1363_v22  ;;  %v1142_v30 = vld [vmem:[%s1721_s1 + $0xd4] sm:$0xf0]  ;;  %v1030_v31 = vld [vmem:[%s1721_s1 + $0x80] sm:$0xf]  ;;  %v1133_v32 = vld [vmem:[%s1721_s1 + $0x8c] sm:$0xf0]  ;;  %v1400_v34 = vor.u32 %v1136_v26, %v1056_v27 }
  0x1c   : > { %394 = vmatpush.bf16.msra.mxu1 %v1350_v17  ;;  %420 = vmatpush.bf16.msra.mxu3 %v1352_v18  ;;  %v1402_v35 = vor.u32 %v1142_v30, %v1070_v28  ;;  %v1131_v36 = vld [vmem:[%s1721_s1 + $0x84] sm:$0xf]  ;;  %v1032_v37 = vld [vmem:[%s1721_s1 + $0x90] sm:$0xf0]  ;;  %v1132_v38 = vld [vmem:[%s1721_s1 + $0x8c] sm:$0xf]  ;;  %v1424_v42 = vor.u32 %v1133_v32, %v1030_v31 }
  0x1d   : > { %v1040_v39 = vld [vmem:[%s1721_s1 + $0x98] sm:$0xf0]  ;;  %v1054_v40 = vld [vmem:[%s1721_s1 + $0xa8] sm:$0xf]  ;;  %v1138_v41 = vld [vmem:[%s1721_s1 + $0xb4] sm:$0xf0]  ;;  %v1436_v46 = vor.u32 %v1131_v36, %v1032_v37 }
  0x1e   : > { %v1426_v43 = vor.u32 %v1138_v41, %v1054_v40  ;;  %v1014_v44 = vld [vmem:[%s1721_s1 + $0x60] sm:$0xf]  ;;  %v1129_v45 = vld [vmem:[%s1721_s1 + $0x6c] sm:$0xf0]  ;;  %v1438_v47 = vor.u32 %v1132_v38, %v1040_v39  ;;  %v1127_v48 = vld [vmem:[%s1721_s1 + $0x64] sm:$0xf] }
  0x1f   : > { %382 = vmatpush.bf16.msra.mxu0 %v1385_v29  ;;  %407 = vmatpush.bf16.msra.mxu2 %v1402_v35  ;;  %v1038_v49 = vld [vmem:[%s1721_s1 + $0x88] sm:$0xf]  ;;  %v1134_v50 = vld [vmem:[%s1721_s1 + $0x94] sm:$0xf0]  ;;  %v1016_v51 = vld [vmem:[%s1721_s1 + $0x70] sm:$0xf0]  ;;  %v1460_v54 = vor.u32 %v1129_v45, %v1014_v44 }
  0x20   : > { %395 = vmatpush.bf16.msra.mxu1 %v1398_v33  ;;  %421 = vmatpush.bf16.msra.mxu3 %v1400_v34  ;;  %v1128_v52 = vld [vmem:[%s1721_s1 + $0x6c] sm:$0xf]  ;;  %v1024_v53 = vld [vmem:[%s1721_s1 + $0x78] sm:$0xf0]  ;;  %v1462_v55 = vor.u32 %v1134_v50, %v1038_v49  ;;  %v998_v56 = vld [vmem:[%s1721_s1 + $0x40] sm:$0xf]  ;;  %v1472_v58 = vor.u32 %v1127_v48, %v1016_v51 }
  0x21   : > { %v1125_v57 = vld [vmem:[%s1721_s1 + $0x4c] sm:$0xf0]  ;;  %v1474_v59 = vor.u32 %v1128_v52, %v1024_v53  ;;  %v1123_v60 = vld [vmem:[%s1721_s1 + $0x44] sm:$0xf]  ;;  %v1022_v61 = vld [vmem:[%s1721_s1 + $0x68] sm:$0xf] }
  0x22   : > { %v1130_v62 = vld [vmem:[%s1721_s1 + $0x74] sm:$0xf0]  ;;  %v1000_v63 = vld [vmem:[%s1721_s1 + $0x50] sm:$0xf0]  ;;  %v1124_v0 = vld [vmem:[%s1721_s1 + $0x4c] sm:$0xf]  ;;  %v1496_v2 = vor.u32 %v1125_v57, %v998_v56 }
  0x23   : > { %383 = vmatpush.bf16.msra.mxu0 %v1424_v42  ;;  %408 = vmatpush.bf16.msra.mxu2 %v1426_v43  ;;  %v1008_v1 = vld [vmem:[%s1721_s1 + $0x58] sm:$0xf0]  ;;  %v1498_v3 = vor.u32 %v1130_v62, %v1022_v61  ;;  %v982_v5 = vld [vmem:[%s1721_s1 + $0x20] sm:$0xf]  ;;  %v1121_v6 = vld [vmem:[%s1721_s1 + $0x2c] sm:$0xf0]  ;;  %v1508_v7 = vor.u32 %v1123_v60, %v1000_v63 }
  0x24   : > { %396 = vmatpush.bf16.msra.mxu1 %v1436_v46  ;;  %422 = vmatpush.bf16.msra.mxu3 %v1438_v47  ;;  %v1510_v10 = vor.u32 %v1124_v0, %v1008_v1  ;;  %v1119_v11 = vld [vmem:[%s1721_s1 + $0x24] sm:$0xf]  ;;  %v1006_v12 = vld [vmem:[%s1721_s1 + $0x48] sm:$0xf]  ;;  %v1126_v14 = vld [vmem:[%s1721_s1 + $0x54] sm:$0xf0]  ;;  %v1532_v20 = vor.u32 %v1121_v6, %v982_v5 }
  0x25   : > { %v984_v15 = vld [vmem:[%s1721_s1 + $0x30] sm:$0xf0]  ;;  %v1120_v16 = vld [vmem:[%s1721_s1 + $0x2c] sm:$0xf]  ;;  %v992_v19 = vld [vmem:[%s1721_s1 + $0x38] sm:$0xf0]  ;;  %v1534_v21 = vor.u32 %v1126_v14, %v1006_v12 }
  0x26   : > { %v966_v23 = vld [vmem:[%s1721_s1] sm:$0xf]  ;;  %v1117_v24 = vld [vmem:[%s1721_s1 + $0xc] sm:$0xf0]  ;;  %v1544_v25 = vor.u32 %v1119_v11, %v984_v15  ;;  %v1546_v26 = vor.u32 %v1120_v16, %v992_v19  ;;  %v1115_v27 = vld [vmem:[%s1721_s1 + $0x4] sm:$0xf] }
  0x27   : > { %384 = vmatpush.bf16.msra.mxu0 %v1460_v54  ;;  %409 = vmatpush.bf16.msra.mxu2 %v1462_v55  ;;  %v990_v28 = vld [vmem:[%s1721_s1 + $0x28] sm:$0xf]  ;;  %v1122_v30 = vld [vmem:[%s1721_s1 + $0x34] sm:$0xf0]  ;;  %v968_v31 = vld [vmem:[%s1721_s1 + $0x10] sm:$0xf0]  ;;  %v1568_v37 = vor.u32 %v1117_v24, %v966_v23 }
  0x28   : > { %397 = vmatpush.bf16.msra.mxu1 %v1472_v58  ;;  %423 = vmatpush.bf16.msra.mxu3 %v1474_v59  ;;  %v1116_v32 = vld [vmem:[%s1721_s1 + $0xc] sm:$0xf]  ;;  %v976_v36 = vld [vmem:[%s1721_s1 + $0x18] sm:$0xf0]  ;;  %v211_v38 = vld [vmem:[#allocation2] sm:$0xff]  ;;  %v1570_v39 = vor.u32 %v1122_v30, %v990_v28  ;;  %v1574_v40 = vor.u32 %v1115_v27, %v968_v31  ;;  %p1110_p6 = scmp.ne.s32.totalorder %s1250_s9, 1 }
  0x29   : > { %v1576_v41 = vor.u32 %v1116_v32, %v976_v36  ;;  %v974_v44 = vld [vmem:[%s1721_s1 + $0x8] sm:$0xf]  ;;  %v1118_v45 = vld [vmem:[%s1721_s1 + $0x14] sm:$0xf0]  ;;  %v219_v48 = vpack.c.bf16 %v211_v38, %v211_v38  ;;  %v213_v50 = vld [vmem:[%s1300_s17] sm:$0xff] }
  0x2a   : > { %v1588_v49 = vor.u32 %v1118_v45, %v974_v44  ;;  %v215_v51 = vunpack.c.l.bf16 %v213_v50  ;;  %v216_v52 = vunpack.c.h.bf16 %v213_v50  ;;  %v214_v60 = vld [vmem:[%s1300_s17 + $0x8] sm:$0xff] }
  0x2b   : > { %385 = vmatpush.bf16.msra.mxu0 %v1496_v2  ;;  %410 = vmatpush.bf16.msra.mxu2 %v1498_v3  ;;  %v218_v0 = vunpack.c.h.bf16 %v214_v60  ;;  %v217_v24 = vunpack.c.l.bf16 %v214_v60 }
  0x2c   : > { %398 = vmatpush.bf16.msra.mxu1 %v1508_v7  ;;  %424 = vmatpush.bf16.msra.mxu3 %v1510_v10 }
  0x2f   : > { %386 = vmatpush.bf16.msra.mxu0 %v1532_v20  ;;  %411 = vmatpush.bf16.msra.mxu2 %v1534_v21 }
  0x30   : > { %399 = vmatpush.bf16.msra.mxu1 %v1544_v25  ;;  %425 = vmatpush.bf16.msra.mxu3 %v1546_v26 }
  0x33   : > { %387 = vmatpush.bf16.msra.mxu0 %v1568_v37  ;;  %412 = vmatpush.bf16.msra.mxu2 %v1570_v39 }
  0x34   : > { %400 = vmatpush.bf16.msra.mxu1 %v1574_v40  ;;  %426 = vmatpush.bf16.msra.mxu3 %v1576_v41 }
  0x36   : > { %388 = vmatmul.bf16.vlgmr.msra.gmra.mxu0 %v219_v48 }
  0x37   : > { %507 = vmatpush.bf16.msrb.mxu0 %v1312_v4  ;;  %401 = vmatmul.bf16.vlgmr.msra.gmra.mxu1 %v219_v48 }
  0x38   : > { %520 = vmatpush.bf16.msrb.mxu1 %v1323_v8  ;;  %546 = vmatpush.bf16.msrb.mxu3 %v1325_v9 }
  0x39   : > { %427 = vmatmul.bf16.vlgmr.msra.gmra.mxu3 %v219_v48  ;;  %413 = vmatpush.bf16.msra.mxu2 %v1588_v49 }
  0x3b   : > { %508 = vmatpush.bf16.msrb.mxu0 %v1337_v13 }
  0x3c   : > { %521 = vmatpush.bf16.msrb.mxu1 %v1350_v17  ;;  %547 = vmatpush.bf16.msrb.mxu3 %v1352_v18 }
  0x3d   : > { %533 = vmatpush.bf16.msrb.mxu2 %v1363_v22 }
  0x3e   : > { %414 = vmatmul.bf16.vlgmr.msra.gmra.mxu2 %v219_v48 }
  0x3f   : > { %509 = vmatpush.bf16.msrb.mxu0 %v1385_v29 }
  0x40   : > { %522 = vmatpush.bf16.msrb.mxu1 %v1398_v33  ;;  %548 = vmatpush.bf16.msrb.mxu3 %v1400_v34 }
  0x41   : > { %534 = vmatpush.bf16.msrb.mxu2 %v1402_v35 }
  0x43   : > { %510 = vmatpush.bf16.msrb.mxu0 %v1424_v42 }
  0x44   : > { %523 = vmatpush.bf16.msrb.mxu1 %v1436_v46  ;;  %549 = vmatpush.bf16.msrb.mxu3 %v1438_v47 }
  0x45   : > { %535 = vmatpush.bf16.msrb.mxu2 %v1426_v43 }
  0x47   : > { %511 = vmatpush.bf16.msrb.mxu0 %v1460_v54 }
  0x48   : > { %524 = vmatpush.bf16.msrb.mxu1 %v1472_v58  ;;  %550 = vmatpush.bf16.msrb.mxu3 %v1474_v59 }
  0x49   : > { %536 = vmatpush.bf16.msrb.mxu2 %v1462_v55 }
  0x4b   : > { %512 = vmatpush.bf16.msrb.mxu0 %v1496_v2 }
  0x4c   : > { %525 = vmatpush.bf16.msrb.mxu1 %v1508_v7  ;;  %551 = vmatpush.bf16.msrb.mxu3 %v1510_v10 }
  0x4d   : > { %537 = vmatpush.bf16.msrb.mxu2 %v1498_v3 }
  0x4f   : > { %513 = vmatpush.bf16.msrb.mxu0 %v1532_v20 }
  0x50   : > { %526 = vmatpush.bf16.msrb.mxu1 %v1544_v25  ;;  %552 = vmatpush.bf16.msrb.mxu3 %v1546_v26 }
  0x51   : > { %538 = vmatpush.bf16.msrb.mxu2 %v1534_v21 }
  0x53   : > { %514 = vmatpush.bf16.msrb.mxu0 %v1568_v37 }
  0x54   : > { %527 = vmatpush.bf16.msrb.mxu1 %v1574_v40  ;;  %553 = vmatpush.bf16.msrb.mxu3 %v1576_v41 }
  0x55   : > { %539 = vmatpush.bf16.msrb.mxu2 %v1570_v39 }
  0x57   : > { %634 = vmatpush.bf16.msra.mxu0 %v1312_v4 }
  0x58   : > { %647 = vmatpush.bf16.msra.mxu1 %v1323_v8  ;;  %673 = vmatpush.bf16.msra.mxu3 %v1325_v9 }
  0x59   : > { %540 = vmatpush.bf16.msrb.mxu2 %v1588_v49 }
  0x5b   : > { %635 = vmatpush.bf16.msra.mxu0 %v1337_v13 }
  0x5c   : > { %648 = vmatpush.bf16.msra.mxu1 %v1350_v17  ;;  %674 = vmatpush.bf16.msra.mxu3 %v1352_v18 }
  0x5d   : > { %660 = vmatpush.bf16.msra.mxu2 %v1363_v22 }
  0x5f   : > { %636 = vmatpush.bf16.msra.mxu0 %v1385_v29 }
  0x60   : > { %649 = vmatpush.bf16.msra.mxu1 %v1398_v33  ;;  %675 = vmatpush.bf16.msra.mxu3 %v1400_v34 }
  0x61   : > { %661 = vmatpush.bf16.msra.mxu2 %v1402_v35 }
  0x63   : > { %637 = vmatpush.bf16.msra.mxu0 %v1424_v42 }
  0x64   : > { %650 = vmatpush.bf16.msra.mxu1 %v1436_v46  ;;  %676 = vmatpush.bf16.msra.mxu3 %v1438_v47 }
  0x65   : > { %662 = vmatpush.bf16.msra.mxu2 %v1426_v43 }
  0x67   : > { %638 = vmatpush.bf16.msra.mxu0 %v1460_v54 }
  0x68   : > { %651 = vmatpush.bf16.msra.mxu1 %v1472_v58  ;;  %677 = vmatpush.bf16.msra.mxu3 %v1474_v59 }
  0x69   : > { %663 = vmatpush.bf16.msra.mxu2 %v1462_v55 }
  0x6b   : > { %639 = vmatpush.bf16.msra.mxu0 %v1496_v2 }
  0x6c   : > { %652 = vmatpush.bf16.msra.mxu1 %v1508_v7  ;;  %678 = vmatpush.bf16.msra.mxu3 %v1510_v10 }
  0x6d   : > { %664 = vmatpush.bf16.msra.mxu2 %v1498_v3 }
  0x6f   : > { %640 = vmatpush.bf16.msra.mxu0 %v1532_v20 }
  0x70   : > { %653 = vmatpush.bf16.msra.mxu1 %v1544_v25  ;;  %679 = vmatpush.bf16.msra.mxu3 %v1546_v26 }
  0x71   : > { %665 = vmatpush.bf16.msra.mxu2 %v1534_v21 }
  0x73   : > { %641 = vmatpush.bf16.msra.mxu0 %v1568_v37 }
  0x74   : > { %654 = vmatpush.bf16.msra.mxu1 %v1574_v40  ;;  %680 = vmatpush.bf16.msra.mxu3 %v1576_v41 }
  0x75   : > { %666 = vmatpush.bf16.msra.mxu2 %v1570_v39 }
  0x79   : > { %667 = vmatpush.bf16.msra.mxu2 %v1588_v49 }
  0xb3   : > { %v389_v53 = vpop.f32.mrf.mxu0 }
  0xb4   : > { %v432_v56 = vadd.f32 %v389_v53, %v215_v51  ;;  %v402_v57 = vpop.f32.mrf.mxu1 }
  0xb5   : > { %v433_v61 = vadd.f32 %v402_v57, %v216_v52 }
  0xb6   : > { %v1092_v62 = vmul.f32 -1.442695, %v432_v56 }
  0xb7   : > { %v1093_v63 = vmul.f32 -1.442695, %v433_v61 }
  0xb8   : > { %1172 = vpow2.f32 %v1092_v62 }
  0xb9   : > { %1174 = vpow2.f32 %v1093_v63 }
  0xbb   : > { %v391_v6 = vpop.f32.mrf.mxu0 }
  0xbc   : > { %v428_v1 = vpop.f32.mrf.mxu3  ;;  %v404_v11 = vpop.f32.mrf.mxu1 }
  0xbd   : > { %v435_v5 = vadd.f32 %v428_v1, %v218_v0  ;;  %v212_v11 = vld [vmem:[#allocation3] sm:$0xff] }
  0xbe   : > { %v1173_v14 = vpop.eup %1172 }
  0xbf   : > { %v1094_v12 = vmul.f32 -1.442695, %v435_v5  ;;  %v1175_v16 = vpop.eup %1174  ;;  %v439_v19 = vadd.f32 1.0, %v1173_v14 }
  0xc0   : > { %v458_v23 = vadd.f32 1.0, %v1175_v16 }
  0xc1   : > { %v415_v15 = vpop.f32.mrf.mxu2  ;;  %1176 = vpow2.f32 %v1094_v12  ;;  %v451_v51 = vand.u32 2147483648, %v439_v19  ;;  %v449_v56 = vand.u32 2147483647, %v439_v19  ;;  %vm445_vm2 = vweird.f32 %v439_v19 }
  0xc2   : > { %1178 = vrcp.f32 %v439_v19  ;;  %v434_v30 = vadd.f32 %v415_v15, %v217_v24  ;;  %v470_v52 = vand.u32 2147483648, %v458_v23  ;;  %v468_v60 = vand.u32 2147483647, %v458_v23 }
  0xc3   : > { %1180 = vrcp.f32 %v458_v23  ;;  %vm464_vm3 = vweird.f32 %v458_v23  ;;  %v452_v1 = vor.u32 1.1754944e-38, %v451_v51  ;;  %vm450_vm6 = vcmp.eq.f32.partialorder %v449_v56, 8.507059e+37 }
  0xc4   : > { %v430_v27 = vpop.f32.mrf.mxu3  ;;  %v471_v6 = vor.u32 1.1754944e-38, %v470_v52  ;;  %vm469_vm7 = vcmp.eq.f32.partialorder %v468_v60, 8.507059e+37 }
  0xc7   : > { %v1177_v28 = vpop.eup %1176 }
  0xc8   : > { %v478_v31 = vadd.f32 1.0, %v1177_v28  ;;  %v1179_v36 = vpop.eup %1178 }
  0xc9   : > { %v417_v32 = vpop.f32.mrf.mxu2  ;;  %v1181_v38 = vpop.eup %1180  ;;  %v441_v44 = vmul.f32 %v1179_v36, %v439_v19  ;;  %vm446_vm0 = vweird.f32 %v1179_v36 }
  0xca   : > { %1182 = vrcp.f32 %v478_v31  ;;  %v460_v45 = vmul.f32 %v1181_v38, %v458_v23  ;;  %vm465_vm1 = vweird.f32 %v1181_v38  ;;  %vm447_vm4 = vmor %vm445_vm2, %vm446_vm0  ;;  %v490_v32 = vand.u32 2147483648, %v478_v31 }
  0xcb   : > { %1184 = vtanh.f32 %v434_v30  ;;  %v442_v48 = vsub.f32 1.0, %v441_v44  ;;  %vm466_vm5 = vmor %vm464_vm3, %vm465_vm1  ;;  %vm484_vm9 = vweird.f32 %v478_v31  ;;  %v488_v44 = vand.u32 2147483647, %v478_v31 }
  0xcc   : > { %v461_v50 = vsub.f32 1.0, %v460_v45  ;;  %v491_v45 = vor.u32 1.1754944e-38, %v490_v32 }
  0xcd   : > { %v443_v53 = vmul.f32 %v1179_v36, %v442_v48  ;;  %vm489_vm11 = vcmp.eq.f32.partialorder %v488_v44, 8.507059e+37 }
  0xce   : > { %v462_v57 = vmul.f32 %v1181_v38, %v461_v50 }
  0xcf   : > { %v444_v62 = vadd.f32 %v1179_v36, %v443_v53 }
  0xd0   : > { %v1183_v61 = vpop.eup %1182  ;;  %v463_v5 = vadd.f32 %v1181_v38, %v462_v57 }
  0xd1   : > { %v1185_v63 = vpop.eup %1184  ;;  %v480_v0 = vmul.f32 %v1183_v61, %v478_v31  ;;  %v448_v12 = vsel %vm447_vm4, %v1179_v36, %v444_v62  ;;  %vm485_vm8 = vweird.f32 %v1183_v61 }
  0xd2   : > { %v453_v15 = vsel %vm450_vm6, %v452_v1, %v448_v12  ;;  %v467_v16 = vsel %vm466_vm5, %v1181_v38, %v463_v5  ;;  %vm486_vm10 = vmor %vm484_vm9, %vm485_vm8 }
  0xd3   : > { %v481_v14 = vsub.f32 1.0, %v480_v0  ;;  %v472_v24 = vsel %vm469_vm7, %v471_v6, %v467_v16  ;;  %v495_v27 = vmul.f32 %v1185_v63, %v453_v15 }
  0xd4   : > { %v494_v28 = vmul.f32 %v472_v24, %v212_v11 }
  0xd5   : > { %v482_v30 = vmul.f32 %v1183_v61, %v481_v14 }
  0xd6   : > { %v1657_v19 = vadd.f32 %v495_v27, %v494_v28 }
  0xd7   : > { %v483_v23 = vadd.f32 %v1183_v61, %v482_v30 }
  0xd8   : > { %1186 = vtanh.f32 %v1657_v19 }
  0xd9   : > { %v487_v36 = vsel %vm486_vm10, %v1183_v61, %v483_v23 }
  0xda   : > { %v492_v38 = vsel %vm489_vm11, %v491_v45, %v487_v36 }
  0xde   : > { %v1187_v48 = vpop.eup %1186 }
  0xdf   : > { %v498_v50 = vmul.f32 %v1187_v48, %v492_v38 }
  0xe1   : > { %v506_v51 = vpack.c.bf16 %v498_v50, %v498_v50 }
  0xe3   : > { %515 = vmatmul.bf16.vlgmr.msrb.gmra.mxu0 %v506_v51  ;;  %528 = vmatmul.bf16.vlgmr.msrb.gmra.mxu1 %v506_v51 }
  0xe4   : > { %541 = vmatmul.bf16.vlgmr.msrb.gmra.mxu2 %v506_v51  ;;  %554 = vmatmul.bf16.vlgmr.msrb.gmra.mxu3 %v506_v51 }
  0xe5   : > { %761 = vmatpush.bf16.msrb.mxu0 %v1312_v4  ;;  %774 = vmatpush.bf16.msrb.mxu1 %v1323_v8  ;;  %v1095_v4 = vld [vmem:[%s1300_s17 + $0x10] sm:$0xff] }
  0xe6   : > { %787 = vmatpush.bf16.msrb.mxu2 %v1363_v22  ;;  %800 = vmatpush.bf16.msrb.mxu3 %v1325_v9  ;;  %v502_v8 = vunpack.c.l.bf16 %v1095_v4  ;;  %v503_v9 = vunpack.c.h.bf16 %v1095_v4  ;;  %v1100_v4 = vld [vmem:[%s1300_s17 + $0x20] sm:$0xff] }
  0xe9   : > { %762 = vmatpush.bf16.msrb.mxu0 %v1337_v13  ;;  %775 = vmatpush.bf16.msrb.mxu1 %v1350_v17 }
  0xea   : > { %788 = vmatpush.bf16.msrb.mxu2 %v1402_v35  ;;  %801 = vmatpush.bf16.msrb.mxu3 %v1352_v18 }
  0xed   : > { %763 = vmatpush.bf16.msrb.mxu0 %v1385_v29  ;;  %776 = vmatpush.bf16.msrb.mxu1 %v1398_v33  ;;  %v1096_v29 = vld [vmem:[%s1300_s17 + $0x18] sm:$0xff] }
  0xee   : > { %789 = vmatpush.bf16.msrb.mxu2 %v1426_v43  ;;  %802 = vmatpush.bf16.msrb.mxu3 %v1400_v34  ;;  %v505_v35 = vunpack.c.h.bf16 %v1096_v29 }
  0xf1   : > { %764 = vmatpush.bf16.msrb.mxu0 %v1424_v42  ;;  %777 = vmatpush.bf16.msrb.mxu1 %v1436_v46 }
  0xf2   : > { %790 = vmatpush.bf16.msrb.mxu2 %v1462_v55  ;;  %803 = vmatpush.bf16.msrb.mxu3 %v1438_v47 }
  0xf5   : > { %765 = vmatpush.bf16.msrb.mxu0 %v1460_v54  ;;  %778 = vmatpush.bf16.msrb.mxu1 %v1472_v58 }
  0xf6   : > { %791 = vmatpush.bf16.msrb.mxu2 %v1498_v3  ;;  %804 = vmatpush.bf16.msrb.mxu3 %v1474_v59 }
  0xf9   : > { %766 = vmatpush.bf16.msrb.mxu0 %v1496_v2  ;;  %779 = vmatpush.bf16.msrb.mxu1 %v1508_v7 }
  0xfa   : > { %792 = vmatpush.bf16.msrb.mxu2 %v1534_v21  ;;  %805 = vmatpush.bf16.msrb.mxu3 %v1510_v10 }
  0xfd   : > { %767 = vmatpush.bf16.msrb.mxu0 %v1532_v20  ;;  %780 = vmatpush.bf16.msrb.mxu1 %v1544_v25  ;;  %v504_v20 = vunpack.c.l.bf16 %v1096_v29  ;;  %v1101_v29 = vld [vmem:[%s1300_s17 + $0x28] sm:$0xff] }
  0xfe   : > { %793 = vmatpush.bf16.msrb.mxu2 %v1570_v39  ;;  %806 = vmatpush.bf16.msrb.mxu3 %v1546_v26 }
 0x101   : > { %768 = vmatpush.bf16.msrb.mxu0 %v1568_v37  ;;  %781 = vmatpush.bf16.msrb.mxu1 %v1574_v40 }
 0x102   : > { %794 = vmatpush.bf16.msrb.mxu2 %v1588_v49  ;;  %807 = vmatpush.bf16.msrb.mxu3 %v1576_v41 }
 0x160   : > { %v516_v13 = vpop.f32.mrf.mxu0  ;;  %v529_v17 = vpop.f32.mrf.mxu1 }
 0x161   : > { %v559_v18 = vadd.f32 %v516_v13, %v502_v8  ;;  %v560_v22 = vadd.f32 %v529_v17, %v503_v9  ;;  %v629_v8 = vunpack.c.l.bf16 %v1100_v4  ;;  %v630_v9 = vunpack.c.h.bf16 %v1100_v4  ;;  %v1105_v4 = vld [vmem:[%s1300_s17 + $0x30] sm:$0xff] }
 0x163   : > { %v1097_v33 = vmul.f32 -1.442695, %v559_v18  ;;  %v1098_v34 = vmul.f32 -1.442695, %v560_v22 }
 0x165   : > { %1188 = vpow2.f32 %v1097_v33 }
 0x166   : > { %1190 = vpow2.f32 %v1098_v34 }
 0x167   : > { %v542_v42 = vpop.f32.mrf.mxu2  ;;  %v555_v43 = vpop.f32.mrf.mxu3 }
 0x168   : > { %v562_v46 = vadd.f32 %v555_v43, %v505_v35  ;;  %v518_v47 = vpop.f32.mrf.mxu0  ;;  %v531_v54 = vpop.f32.mrf.mxu1  ;;  %v561_v37 = vadd.f32 %v542_v42, %v504_v20  ;;  %v632_v35 = vunpack.c.h.bf16 %v1101_v29  ;;  %v631_v20 = vunpack.c.l.bf16 %v1101_v29  ;;  %v1106_v29 = vld [vmem:[%s1300_s17 + $0x38] sm:$0xff] }
 0x16a   : > { %v1099_v55 = vmul.f32 -1.442695, %v562_v46 }
 0x16b   : > { %v1189_v58 = vpop.eup %1188 }
 0x16c   : > { %v1191_v59 = vpop.eup %1190  ;;  %v566_v2 = vadd.f32 1.0, %v1189_v58  ;;  %1192 = vpow2.f32 %v1099_v55 }
 0x16d   : > { %v585_v3 = vadd.f32 1.0, %v1191_v59 }
 0x16e   : > { %1194 = vrcp.f32 %v566_v2  ;;  %v578_v52 = vand.u32 2147483648, %v566_v2  ;;  %v576_v57 = vand.u32 2147483647, %v566_v2  ;;  %vm572_vm14 = vweird.f32 %v566_v2 }
 0x16f   : > { %1196 = vrcp.f32 %v585_v3  ;;  %v544_v7 = vpop.f32.mrf.mxu2  ;;  %v557_v10 = vpop.f32.mrf.mxu3  ;;  %v597_v53 = vand.u32 2147483648, %v585_v3  ;;  %v595_v61 = vand.u32 2147483647, %v585_v3  ;;  %vm591_vm15 = vweird.f32 %v585_v3 }
 0x170   : > { %v579_v0 = vor.u32 1.1754944e-38, %v578_v52  ;;  %vm577_vm2 = vcmp.eq.f32.partialorder %v576_v57, 8.507059e+37 }
 0x171   : > { %v598_v6 = vor.u32 1.1754944e-38, %v597_v53  ;;  %vm596_vm3 = vcmp.eq.f32.partialorder %v595_v61, 8.507059e+37 }
 0x172   : > { %v1193_v21 = vpop.eup %1192 }
 0x173   : > { %v605_v25 = vadd.f32 1.0, %v1193_v21 }
 0x174   : > { %v1195_v26 = vpop.eup %1194 }
 0x175   : > { %v1197_v39 = vpop.eup %1196  ;;  %v568_v40 = vmul.f32 %v1195_v26, %v566_v2  ;;  %1198 = vrcp.f32 %v605_v25  ;;  %vm573_vm12 = vweird.f32 %v1195_v26  ;;  %v617_v44 = vand.u32 2147483648, %v605_v25 }
 0x176   : > { %v587_v41 = vmul.f32 %v1197_v39, %v585_v3  ;;  %1200 = vtanh.f32 %v561_v37  ;;  %vm592_vm13 = vweird.f32 %v1197_v39  ;;  %vm574_vm0 = vmor %vm572_vm14, %vm573_vm12  ;;  %vm611_vm5 = vweird.f32 %v605_v25 }
 0x177   : > { %v569_v49 = vsub.f32 1.0, %v568_v40  ;;  %vm593_vm1 = vmor %vm591_vm15, %vm592_vm13  ;;  %v615_v36 = vand.u32 2147483647, %v605_v25  ;;  %v618_v48 = vor.u32 1.1754944e-38, %v617_v44 }
 0x178   : > { %v588_v31 = vsub.f32 1.0, %v587_v41 }
 0x179   : > { %v570_v56 = vmul.f32 %v1195_v26, %v569_v49  ;;  %vm616_vm7 = vcmp.eq.f32.partialorder %v615_v36, 8.507059e+37 }
 0x17a   : > { %v589_v60 = vmul.f32 %v1197_v39, %v588_v31 }
 0x17b   : > { %v1199_v62 = vpop.eup %1198  ;;  %v571_v63 = vadd.f32 %v1195_v26, %v570_v56 }
 0x17c   : > { %v590_v1 = vadd.f32 %v1197_v39, %v589_v60  ;;  %v607_v5 = vmul.f32 %v1199_v62, %v605_v25  ;;  %v1201_v12 = vpop.eup %1200  ;;  %vm612_vm4 = vweird.f32 %v1199_v62 }
 0x17d   : > { %v575_v11 = vsel %vm574_vm0, %v1195_v26, %v571_v63  ;;  %vm613_vm6 = vmor %vm611_vm5, %vm612_vm4 }
 0x17e   : > { %v580_v14 = vsel %vm577_vm2, %v579_v0, %v575_v11  ;;  %v594_v15 = vsel %vm593_vm1, %v1197_v39, %v590_v1  ;;  %v608_v16 = vsub.f32 1.0, %v607_v5 }
 0x17f   : > { %v599_v24 = vsel %vm596_vm3, %v598_v6, %v594_v15  ;;  %v622_v27 = vmul.f32 %v1201_v12, %v580_v14 }
 0x180   : > { %v621_v28 = vmul.f32 %v599_v24, %v1657_v19  ;;  %v609_v30 = vmul.f32 %v1199_v62, %v608_v16 }
 0x182   : > { %v1695_v23 = vadd.f32 %v622_v27, %v621_v28  ;;  %v610_v32 = vadd.f32 %v1199_v62, %v609_v30 }
 0x184   : > { %1202 = vtanh.f32 %v1695_v23  ;;  %v614_v45 = vsel %vm613_vm6, %v1199_v62, %v610_v32 }
 0x185   : > { %v619_v50 = vsel %vm616_vm7, %v618_v48, %v614_v45 }
 0x18a   : > { %v1203_v38 = vpop.eup %1202 }
 0x18b   : > { %v625_v51 = vmul.f32 %v1203_v38, %v619_v50 }
 0x18d   : > { %v633_v19 = vpack.c.bf16 %v625_v51, %v625_v51 }
 0x18f   : > { %642 = vmatmul.bf16.vlgmr.msra.gmra.mxu0 %v633_v19  ;;  %655 = vmatmul.bf16.vlgmr.msra.gmra.mxu1 %v633_v19 }
 0x190   : > { %668 = vmatmul.bf16.vlgmr.msra.gmra.mxu2 %v633_v19  ;;  %681 = vmatmul.bf16.vlgmr.msra.gmra.mxu3 %v633_v19 }
 0x20c   : > { %v643_v13 = vpop.f32.mrf.mxu0  ;;  %v656_v17 = vpop.f32.mrf.mxu1 }
 0x20d   : > { %v686_v18 = vadd.f32 %v643_v13, %v629_v8  ;;  %v687_v22 = vadd.f32 %v656_v17, %v630_v9  ;;  %v756_v8 = vunpack.c.l.bf16 %v1105_v4  ;;  %v757_v9 = vunpack.c.h.bf16 %v1105_v4 }
 0x20f   : > { %v1102_v33 = vmul.f32 -1.442695, %v686_v18  ;;  %v1103_v34 = vmul.f32 -1.442695, %v687_v22 }
 0x211   : > { %1204 = vpow2.f32 %v1102_v33 }
 0x212   : > { %1206 = vpow2.f32 %v1103_v34 }
 0x213   : > { %v669_v42 = vpop.f32.mrf.mxu2  ;;  %v682_v43 = vpop.f32.mrf.mxu3 }
 0x214   : > { %v689_v46 = vadd.f32 %v682_v43, %v632_v35  ;;  %v645_v47 = vpop.f32.mrf.mxu0  ;;  %v658_v54 = vpop.f32.mrf.mxu1  ;;  %v688_v37 = vadd.f32 %v669_v42, %v631_v20  ;;  %v759_v35 = vunpack.c.h.bf16 %v1106_v29  ;;  %v758_v20 = vunpack.c.l.bf16 %v1106_v29 }
 0x216   : > { %v1104_v55 = vmul.f32 -1.442695, %v689_v46 }
 0x217   : > { %v1205_v58 = vpop.eup %1204 }
 0x218   : > { %v1207_v59 = vpop.eup %1206  ;;  %v693_v2 = vadd.f32 1.0, %v1205_v58  ;;  %1208 = vpow2.f32 %v1104_v55 }
 0x219   : > { %v712_v3 = vadd.f32 1.0, %v1207_v59 }
 0x21a   : > { %1210 = vrcp.f32 %v693_v2  ;;  %v705_v52 = vand.u32 2147483648, %v693_v2  ;;  %v703_v57 = vand.u32 2147483647, %v693_v2  ;;  %vm699_vm10 = vweird.f32 %v693_v2 }
 0x21b   : > { %1212 = vrcp.f32 %v712_v3  ;;  %v671_v7 = vpop.f32.mrf.mxu2  ;;  %v684_v10 = vpop.f32.mrf.mxu3  ;;  %v724_v53 = vand.u32 2147483648, %v712_v3  ;;  %v722_v61 = vand.u32 2147483647, %v712_v3  ;;  %vm718_vm11 = vweird.f32 %v712_v3 }
 0x21c   : > { %v706_v0 = vor.u32 1.1754944e-38, %v705_v52  ;;  %vm704_vm14 = vcmp.eq.f32.partialorder %v703_v57, 8.507059e+37 }
 0x21d   : > { %v725_v6 = vor.u32 1.1754944e-38, %v724_v53  ;;  %vm723_vm15 = vcmp.eq.f32.partialorder %v722_v61, 8.507059e+37 }
 0x21e   : > { %v1209_v21 = vpop.eup %1208 }
 0x21f   : > { %v732_v25 = vadd.f32 1.0, %v1209_v21 }
 0x220   : > { %v1211_v26 = vpop.eup %1210 }
 0x221   : > { %v1213_v39 = vpop.eup %1212  ;;  %v695_v40 = vmul.f32 %v1211_v26, %v693_v2  ;;  %1214 = vrcp.f32 %v732_v25  ;;  %vm700_vm8 = vweird.f32 %v1211_v26  ;;  %v744_v36 = vand.u32 2147483648, %v732_v25 }
 0x222   : > { %v714_v41 = vmul.f32 %v1213_v39, %v712_v3  ;;  %1216 = vtanh.f32 %v688_v37  ;;  %vm719_vm9 = vweird.f32 %v1213_v39  ;;  %vm701_vm12 = vmor %vm699_vm10, %vm700_vm8  ;;  %vm738_vm1 = vweird.f32 %v732_v25 }
 0x223   : > { %v696_v49 = vsub.f32 1.0, %v695_v40  ;;  %vm720_vm13 = vmor %vm718_vm11, %vm719_vm9  ;;  %v742_v45 = vand.u32 2147483647, %v732_v25  ;;  %v745_v38 = vor.u32 1.1754944e-38, %v744_v36 }
 0x224   : > { %v715_v31 = vsub.f32 1.0, %v714_v41 }
 0x225   : > { %v697_v56 = vmul.f32 %v1211_v26, %v696_v49  ;;  %vm743_vm3 = vcmp.eq.f32.partialorder %v742_v45, 8.507059e+37 }
 0x226   : > { %v716_v60 = vmul.f32 %v1213_v39, %v715_v31 }
 0x227   : > { %v1215_v62 = vpop.eup %1214  ;;  %v698_v63 = vadd.f32 %v1211_v26, %v697_v56 }
 0x228   : > { %v717_v1 = vadd.f32 %v1213_v39, %v716_v60  ;;  %v734_v5 = vmul.f32 %v1215_v62, %v732_v25  ;;  %v1217_v12 = vpop.eup %1216  ;;  %vm739_vm0 = vweird.f32 %v1215_v62 }
 0x229   : > { %v702_v11 = vsel %vm701_vm12, %v1211_v26, %v698_v63  ;;  %vm740_vm2 = vmor %vm738_vm1, %vm739_vm0 }
 0x22a   : > { %v707_v14 = vsel %vm704_vm14, %v706_v0, %v702_v11  ;;  %v721_v15 = vsel %vm720_vm13, %v1213_v39, %v717_v1  ;;  %v735_v16 = vsub.f32 1.0, %v734_v5 }
 0x22b   : > { %v726_v24 = vsel %vm723_vm15, %v725_v6, %v721_v15  ;;  %v749_v27 = vmul.f32 %v1217_v12, %v707_v14 }
 0x22c   : > { %v748_v28 = vmul.f32 %v726_v24, %v1695_v23  ;;  %v736_v30 = vmul.f32 %v1215_v62, %v735_v16 }
 0x22e   : > { %v1701_v32 = vadd.f32 %v749_v27, %v748_v28  ;;  %v737_v44 = vadd.f32 %v1215_v62, %v736_v30 }
 0x230   : > { %1218 = vtanh.f32 %v1701_v32  ;;  %v741_v48 = vsel %vm740_vm2, %v1215_v62, %v737_v44 }
 0x231   : > { %v746_v51 = vsel %vm743_vm3, %v745_v38, %v741_v48 }
 0x236   : > { %v1219_v50 = vpop.eup %1218 }
 0x237   : > { %v752_v19 = vmul.f32 %v1219_v50, %v746_v51 }
 0x239   : > { %v760_v23 = vpack.c.bf16 %v752_v19, %v752_v19 }
 0x23b   : > { %769 = vmatmul.bf16.vlgmr.msrb.gmra.mxu0 %v760_v23  ;;  %782 = vmatmul.bf16.vlgmr.msrb.gmra.mxu1 %v760_v23 }
 0x23c   : > { %795 = vmatmul.bf16.vlgmr.msrb.gmra.mxu2 %v760_v23  ;;  %808 = vmatmul.bf16.vlgmr.msrb.gmra.mxu3 %v760_v23 }
 0x2b8   : > { %v770_v13 = vpop.f32.mrf.mxu0  ;;  %v783_v17 = vpop.f32.mrf.mxu1 }
 0x2b9   : > { %v813_v18 = vadd.f32 %v770_v13, %v756_v8  ;;  %v814_v22 = vadd.f32 %v783_v17, %v757_v9 }
 0x2bb   : > { %v1107_v33 = vmul.f32 -1.442695, %v813_v18  ;;  %v1108_v34 = vmul.f32 -1.442695, %v814_v22 }
 0x2bd   : > { %1220 = vpow2.f32 %v1107_v33 }
 0x2be   : > { %1222 = vpow2.f32 %v1108_v34 }
 0x2bf   : > { %v796_v42 = vpop.f32.mrf.mxu2  ;;  %v809_v43 = vpop.f32.mrf.mxu3 }
 0x2c0   : > { %v816_v46 = vadd.f32 %v809_v43, %v759_v35  ;;  %v772_v47 = vpop.f32.mrf.mxu0  ;;  %v785_v54 = vpop.f32.mrf.mxu1  ;;  %v815_v37 = vadd.f32 %v796_v42, %v758_v20 }
 0x2c2   : > { %v1109_v55 = vmul.f32 -1.442695, %v816_v46 }
 0x2c3   : > { %v1221_v58 = vpop.eup %1220 }
 0x2c4   : > { %v1223_v59 = vpop.eup %1222  ;;  %v820_v2 = vadd.f32 1.0, %v1221_v58  ;;  %1224 = vpow2.f32 %v1109_v55 }
 0x2c5   : > { %v839_v3 = vadd.f32 1.0, %v1223_v59 }
 0x2c6   : > { %1226 = vrcp.f32 %v820_v2  ;;  %v832_v52 = vand.u32 2147483648, %v820_v2  ;;  %v830_v57 = vand.u32 2147483647, %v820_v2  ;;  %vm826_vm6 = vweird.f32 %v820_v2 }
 0x2c7   : > { %1228 = vrcp.f32 %v839_v3  ;;  %v798_v7 = vpop.f32.mrf.mxu2  ;;  %v811_v10 = vpop.f32.mrf.mxu3  ;;  %v851_v53 = vand.u32 2147483648, %v839_v3  ;;  %v849_v61 = vand.u32 2147483647, %v839_v3  ;;  %vm845_vm7 = vweird.f32 %v839_v3 }
 0x2c8   : > { %v833_v0 = vor.u32 1.1754944e-38, %v832_v52  ;;  %vm831_vm10 = vcmp.eq.f32.partialorder %v830_v57, 8.507059e+37 }
 0x2c9   : > { %v852_v6 = vor.u32 1.1754944e-38, %v851_v53  ;;  %vm850_vm11 = vcmp.eq.f32.partialorder %v849_v61, 8.507059e+37 }
 0x2ca   : > { %v1225_v21 = vpop.eup %1224 }
 0x2cb   : > { %v859_v25 = vadd.f32 1.0, %v1225_v21 }
 0x2cc   : > { %v1227_v26 = vpop.eup %1226 }
 0x2cd   : > { %v1229_v39 = vpop.eup %1228  ;;  %v822_v40 = vmul.f32 %v1227_v26, %v820_v2  ;;  %1230 = vrcp.f32 %v859_v25  ;;  %vm827_vm4 = vweird.f32 %v1227_v26  ;;  %v871_v45 = vand.u32 2147483648, %v859_v25 }
 0x2ce   : > { %v841_v41 = vmul.f32 %v1229_v39, %v839_v3  ;;  %1232 = vtanh.f32 %v815_v37  ;;  %vm846_vm5 = vweird.f32 %v1229_v39  ;;  %vm828_vm8 = vmor %vm826_vm6, %vm827_vm4  ;;  %vm865_vm13 = vweird.f32 %v859_v25 }
 0x2cf   : > { %v823_v49 = vsub.f32 1.0, %v822_v40  ;;  %vm847_vm9 = vmor %vm845_vm7, %vm846_vm5  ;;  %v869_v48 = vand.u32 2147483647, %v859_v25  ;;  %v872_v50 = vor.u32 1.1754944e-38, %v871_v45 }
 0x2d0   : > { %v842_v31 = vsub.f32 1.0, %v841_v41 }
 0x2d1   : > { %v824_v56 = vmul.f32 %v1227_v26, %v823_v49  ;;  %vm870_vm15 = vcmp.eq.f32.partialorder %v869_v48, 8.507059e+37 }
 0x2d2   : > { %v843_v60 = vmul.f32 %v1229_v39, %v842_v31 }
 0x2d3   : > { %v1231_v62 = vpop.eup %1230  ;;  %v825_v63 = vadd.f32 %v1227_v26, %v824_v56 }
 0x2d4   : > { %v844_v1 = vadd.f32 %v1229_v39, %v843_v60  ;;  %v861_v5 = vmul.f32 %v1231_v62, %v859_v25  ;;  %v1233_v12 = vpop.eup %1232  ;;  %vm866_vm12 = vweird.f32 %v1231_v62 }
 0x2d5   : > { %v829_v11 = vsel %vm828_vm8, %v1227_v26, %v825_v63  ;;  %vm867_vm14 = vmor %vm865_vm13, %vm866_vm12 }
 0x2d6   : > { %v834_v14 = vsel %vm831_vm10, %v833_v0, %v829_v11  ;;  %v848_v15 = vsel %vm847_vm9, %v1229_v39, %v844_v1  ;;  %v862_v16 = vsub.f32 1.0, %v861_v5 }
 0x2d7   : > { %v853_v24 = vsel %vm850_vm11, %v852_v6, %v848_v15  ;;  %v876_v27 = vmul.f32 %v1233_v12, %v834_v14 }
 0x2d8   : > { %v875_v28 = vmul.f32 %v853_v24, %v1701_v32  ;;  %v863_v30 = vmul.f32 %v1231_v62, %v862_v16 }
 0x2da   : > { %v877_v44 = vadd.f32 %v876_v27, %v875_v28  ;;  %v864_v36 = vadd.f32 %v1231_v62, %v863_v30 }
 0x2dc   : > { %1234 = vtanh.f32 %v877_v44  ;;  %881 = vst [vmem:[#allocation3] sm:$0xff] %v877_v44  ;;  %v868_v38 = vsel %vm867_vm14, %v1231_v62, %v864_v36 }
 0x2dd   : > { %v873_v19 = vsel %vm870_vm15, %v872_v50, %v868_v38 }
 0x2e1   : > { %885 = sbr.rel (%p1110_p6) target bundleno = 745 (0x2e9), region = 36 }
 0x2e2   : > { %v1235_v51 = vpop.eup %1234 }
 0x2e3   : > { %v879_v23 = vmul.f32 %v1235_v51, %v873_v19 }
 0x2e5   : > { %880 = vst [vmem:[#allocation2] sm:$0xff] %v879_v23 }
 0x2e6   : > { %v886_v32 = vpack.c.bf16 %v879_v23, %v879_v23 }
 0x2e8   : > { %887 = vst [vmem:[%s1722_s2] sm:$0xf] %v886_v32 }
 0x2e9 PF: > { %s12_s11 = sadd.s32 1, %s1258_s11   ;;  %s1723_s9 = smov %s1254_s10 }
 0x2ea   : > { %p9_p7 = scmp.ge.s32.totalorder %s12_s11, 4   ;;  %s1724_s10 = smov %s1726_s12 }
 0x2ec   :  { %11 = sbr.rel (!%p9_p7) target bundleno = 2 (0x2), region = 69 }

</bundles_post_ra>
